<compile_context>
chip_gen: v7x
topology: tpu7x:2x2x1
jax: 0.10.0
libtpu: 0.0.40
codegen_flags: <defaults>
</compile_context>

<pallas_src>
from functools import partial

import jax
import jax.numpy as jnp
from jax import lax
from jax.experimental import pallas as pl
from jax.experimental.pallas import tpu as pltpu


def _round_up(x, m):
    return ((x + m - 1) // m) * m


def _cross_attention_kernel(q_ref, k_ref, v_ref, wq_ref, bq_ref, o_ref, *,
                            n2_valid, cr):
    # q_ref : (Cq, TQ)      channels-first query tile (MXU dtype)
    # k_ref : (Ch, N2p)     precomputed keys for this batch element
    # v_ref : (Cr+1, N2p)   reference features with a trailing ones row
    # wq_ref: (Cq, Ch)      1x1-conv weight for the query projection
    # bq_ref: (Ch, 1)       query projection bias (f32)
    # o_ref : (Cr, TQ)      attended features (lane-dense output)
    q = q_ref[...]
    k = k_ref[...]
    v = v_ref[...]

    # Q = wq^T @ q + bq -> (Ch, TQ); contract the input-channel axis directly
    # on the MXU (no transpose), accumulate in f32.
    qh = lax.dot_general(wq_ref[...], q, (((0,), (0,)), ((), ())),
                         preferred_element_type=jnp.float32) + bq_ref[...]
    qh = qh.astype(k.dtype)

    # Scores: contract the hidden-channel axis of Q and K -> (TQ, N2p).
    s = lax.dot_general(qh, k, (((0,), (0,)), ((), ())),
                        preferred_element_type=jnp.float32)

    # Mask padded key columns (static branch: only emitted when padding).
    if s.shape[-1] > n2_valid:
        col = lax.broadcasted_iota(jnp.int32, s.shape, 1)
        s = jnp.where(col < n2_valid, s, jnp.float32(-1e30))

    # Numerically-stable softmax; normalization deferred to the output.
    s = s - jnp.max(s, axis=-1, keepdims=True)
    p = jnp.exp(s).astype(v.dtype)     # exp in f32, MXU operand in MXU dtype

    # (Cr+1, N2p) x (TQ, N2p)^T -> (Cr+1, TQ); the appended ones row of V
    # yields the softmax denominators for free (no second pass over p).
    out = lax.dot_general(v, p, (((1,), (1,)), ((), ())),
                          preferred_element_type=jnp.float32)

    denom = out[cr:cr + 1, :]          # (1, TQ), lane-major
    numer = out[:cr, :]                # (Cr, TQ)
    inv = pl.reciprocal(denom, approx=True)
    inv = inv * (2.0 - denom * inv)    # one Newton step (cheap VPU) for accuracy
    o_ref[...] = (numer * inv).astype(o_ref.dtype)


@partial(jax.jit, static_argnames=("tile_q", "single_buffer"))
def _cross_attention_impl(query, reference, wq, bq, wk, bk, *, tile_q,
                          single_buffer):
    B, Cq, H1, W1 = query.shape
    _, Cr, H2, W2 = reference.shape
    Ch = wq.shape[1]
    N1, N2 = H1 * W1, H2 * W2
    N2p = _round_up(N2, 128)

    out_dtype = query.dtype
    # f32 models: run the MXU with bf16 operands + f32 accumulation.
    mxu_dtype = jnp.bfloat16 if out_dtype == jnp.float32 else out_dtype
    mxu_bytes = jnp.dtype(mxu_dtype).itemsize
    out_bytes = jnp.dtype(out_dtype).itemsize

    # Free reshapes only (contiguous NCHW -> (B, C, HW)) + one-time casts.
    q_mx = query.reshape(B, Cq, N1).astype(mxu_dtype)
    r_mx = reference.reshape(B, Cr, N2).astype(mxu_dtype)
    wq_mx = wq.astype(mxu_dtype)

    # Hoist K = Conv1x1_k(reference): computed once per batch element outside
    # the kernel so it is not recomputed for every query tile.
    k_pre = (jnp.einsum('ch,bcn->bhn', wk.astype(mxu_dtype), r_mx,
                        preferred_element_type=jnp.float32)
             + bk.astype(jnp.float32)[None, :, None]).astype(mxu_dtype)

    # V with a ones row appended (denominator fold); pad the key axis to a
    # multiple of 128 for lane-dense vregs (padded columns masked in-kernel).
    v_aug = jnp.concatenate([r_mx, jnp.ones((B, 1, N2), mxu_dtype)], axis=1)
    if N2p != N2:
        pad = ((0, 0), (0, 0), (0, N2p - N2))
        v_aug = jnp.pad(v_aug, pad)
        k_pre = jnp.pad(k_pre, pad)

    bq2 = bq.reshape(Ch, 1).astype(jnp.float32)

    # ---- Per-generation VMEM budget & query-tile selection -----------------
    try:
        vmem_cap = int(pltpu.get_tpu_info().vmem_capacity_bytes)
    except Exception:
        vmem_cap = 64 * 1024 * 1024           # conservative (v7x per-core)
    vmem_limit = min(int(vmem_cap * 0.8), 100 * 1024 * 1024)
    budget = vmem_limit - (8 << 20)           # headroom for Mosaic scratch

    kv_mult = 1 if single_buffer else 2       # K/V/wq buffering factor

    def vmem_bytes(tq):
        fixed = kv_mult * ((Ch + Cr + 1) * N2p + Cq * Ch) * mxu_bytes
        fixed += 2 * Ch * 4                                      # bias
        bufs = 2 * Cq * tq * mxu_bytes + 2 * Cr * tq * out_bytes
        live = (Ch * tq * (4 + mxu_bytes)                        # qh f32+cast
                + tq * N2p * (4 + mxu_bytes)                     # s f32 + p
                + (Cr + 1) * tq * 4)                             # f32 out acc
        return fixed + bufs + live

    max_tq = max(128, _round_up(tile_q, 128))
    TQ = N1 if N1 <= max_tq else max_tq
    # Megacore occupancy guard: keep at least 2 grid programs when possible.
    if B * ((N1 + TQ - 1) // TQ) < 2 and N1 >= 256:
        TQ = _round_up((N1 + 1) // 2, 128)
    # Shrink TQ (multiples of 128) until the working set fits the budget.
    while TQ > 128 and vmem_bytes(TQ) > budget:
        TQ = _round_up(max(N1 // 2, 1), 128) if TQ == N1 else max(128, TQ - 128)
    # TODO(synk): for very large reference maps (N2 >~ 8k), add a third
    # "arbitrary" grid axis over N2 with online-softmax (m, l, acc) scratch so
    # the live score tile becomes (TQ, TK) instead of (TQ, N2).

    grid = (B, pl.cdiv(N1, TQ))
    kv_kwargs = {"pipeline_mode": pl.Buffered(1)} if single_buffer else {}

    flops = 2 * B * N1 * (Cq * Ch + N2p * Ch + N2p * (Cr + 1))
    bytes_accessed = ((q_mx.size + k_pre.size + v_aug.size + wq_mx.size)
                      * mxu_bytes + bq2.size * 4 + B * Cr * N1 * out_bytes)

    out_flat = pl.pallas_call(
        partial(_cross_attention_kernel, n2_valid=N2, cr=Cr),
        out_shape=jax.ShapeDtypeStruct((B, Cr, N1), out_dtype),
        grid_spec=pltpu.PrefetchScalarGridSpec(
            num_scalar_prefetch=0,
            grid=grid,
            in_specs=[
                pl.BlockSpec((None, Cq, TQ), lambda b, i: (b, 0, i)),
                pl.BlockSpec((None, Ch, N2p), lambda b, i: (b, 0, 0),
                             **kv_kwargs),
                pl.BlockSpec((None, Cr + 1, N2p), lambda b, i: (b, 0, 0),
                             **kv_kwargs),
                pl.BlockSpec((Cq, Ch), lambda b, i: (0, 0), **kv_kwargs),
                pl.BlockSpec((Ch, 1), lambda b, i: (0, 0)),
            ],
            out_specs=pl.BlockSpec((None, Cr, TQ), lambda b, i: (b, 0, i)),
        ),
        compiler_params=pltpu.CompilerParams(
            dimension_semantics=("parallel", "parallel"),
            vmem_limit_bytes=vmem_limit),
        cost_estimate=pl.CostEstimate(
            flops=flops,
            transcendentals=B * N1 * N2p,
            bytes_accessed=bytes_accessed),
    )(q_mx, k_pre, v_aug, wq_mx, bq2)

    # (B, Cr, N1) -> (B, Cr, H1, W1): free reshape, no transpose needed.
    return out_flat.reshape(B, Cr, H1, W1)


_SINGLE_BUFFER_OK = None   # memoized: does this JAX build accept Buffered(1)?


def cross_attention_layer(query, reference, wq, bq, wk, bk, *, tile_q=512):
    """query: (B, Cq, H1, W1) NCHW; reference: (B, Cr, H2, W2) NCHW.
    wq: (Cq, Ch), bq: (Ch,), wk: (Cr, Ch), bk: (Ch,). Returns (B, Cr, H1, W1)."""
    global _SINGLE_BUFFER_OK
    if _SINGLE_BUFFER_OK is None:
        try:
            out = _cross_attention_impl(query, reference, wq, bq, wk, bk,
                                        tile_q=tile_q, single_buffer=True)
            _SINGLE_BUFFER_OK = True
            return out
        except Exception:
            # pl.Buffered(1) not supported on this JAX build -> default specs.
            _SINGLE_BUFFER_OK = False
    return _cross_attention_impl(query, reference, wq, bq, wk, bk,
                                 tile_q=tile_q,
                                 single_buffer=_SINGLE_BUFFER_OK)


def _reference_forward(query, reference, wq, bq, wk, bk):
    """Pure-JAX replica of the PyTorch forward for verification."""
    B, Cq, H1, W1 = query.shape
    _, Cr, H2, W2 = reference.shape
    Q = jnp.einsum('bchw,cd->bdhw', query, wq) + bq[None, :, None, None]
    K = jnp.einsum('bchw,cd->bdhw', reference, wk) + bk[None, :, None, None]
    V = reference.reshape(B, Cr, H2 * W2)
    attn = jnp.einsum('bcij,bckl->bijkl', Q, K).reshape(B, H1, W1, H2 * W2)
    attn = jax.nn.softmax(attn, axis=3)
    return jnp.einsum('bijp,bcp->bcij', attn, V)


if __name__ == "__main__":
    key = jax.random.PRNGKey(0)
    k1, k2, k3, k4, k5, k6 = jax.random.split(key, 6)

    B = 2
    query_dim = 4      # Cq
    refer_dim = 8      # Cr
    hidden = 32        # Ch  (PyTorch default is 256; kept small here)
    H1 = W1 = 8
    H2 = W2 = 8

    query = jax.random.normal(k1, (B, query_dim, H1, W1), dtype=jnp.float32)
    reference = jax.random.normal(k2, (B, refer_dim, H2, W2), dtype=jnp.float32)

    # Conv2d(kernel_size=1) weights, stored as (in_ch, out_ch) matmul matrices.
    wq = 0.1 * jax.random.normal(k3, (query_dim, hidden), dtype=jnp.float32)
    bq = 0.1 * jax.random.normal(k4, (hidden,), dtype=jnp.float32)
    wk = 0.1 * jax.random.normal(k5, (refer_dim, hidden), dtype=jnp.float32)
    bk = 0.1 * jax.random.normal(k6, (hidden,), dtype=jnp.float32)

    out = cross_attention_layer(query, reference, wq, bq, wk, bk)
    out = jax.block_until_ready(out)

    ref = _reference_forward(query, reference, wq, bq, wk, bk)
    assert out.shape == (B, refer_dim, H1, W1)
    # bf16 MXU operands (f32 accumulation) -> tolerance ~1e-2.
    assert jnp.allclose(out, ref, atol=1e-2, rtol=1e-2), (
        float(jnp.max(jnp.abs(out - ref))))

    print("KERNEL_OK")
</pallas_src>

<mosaic_0001>
module attributes {stable_mosaic.version = 11 : i64} {
  func.func @_cross_attention_kernel(%arg0: i32, %arg1: i32, %arg2: memref<1x4x64xbf16, #tpu.memory_space<vmem>>, %arg3: memref<1x32x128xbf16, #tpu.memory_space<vmem>>, %arg4: memref<1x9x128xbf16, #tpu.memory_space<vmem>>, %arg5: memref<4x32xbf16, #tpu.memory_space<vmem>>, %arg6: memref<32x1xf32, #tpu.memory_space<vmem>>, %arg7: memref<1x8x64xf32, #tpu.memory_space<vmem>>) attributes {dimension_semantics = [#tpu.dimension_semantics<parallel>, #tpu.dimension_semantics<parallel>], iteration_bounds = array<i64: 2, 1>, scalar_prefetch = 0 : i64, scratch_operands = 0 : i64, tpu.core_type = #tpu.core_type<tc>, window_params = [{transform_indices = @transform_0, window_bounds = array<i64: 1, 4, 64>}, {pipeline_mode = #tpu.pipeline_mode<synchronous>, transform_indices = @transform_1, window_bounds = array<i64: 1, 32, 128>}, {pipeline_mode = #tpu.pipeline_mode<synchronous>, transform_indices = @transform_2, window_bounds = array<i64: 1, 9, 128>}, {pipeline_mode = #tpu.pipeline_mode<synchronous>, transform_indices = @transform_3, window_bounds = array<i64: 4, 32>}, {pipeline_mode = #tpu.pipeline_mode<synchronous>, transform_indices = @transform_4, window_bounds = array<i64: 32, 1>}, {transform_indices = @transform_5, window_bounds = array<i64: 1, 8, 64>}]} {
    %c0 = arith.constant 0 : index
    %c0_0 = arith.constant 0 : index
    %c0_1 = arith.constant 0 : index
    %0 = vector.load %arg2[%c0, %c0_0, %c0_1] : memref<1x4x64xbf16, #tpu.memory_space<vmem>>, vector<1x4x64xbf16>
    %1 = vector.shape_cast %0 : vector<1x4x64xbf16> to vector<4x64xbf16>
    %c0_2 = arith.constant 0 : index
    %c0_3 = arith.constant 0 : index
    %c0_4 = arith.constant 0 : index
    %2 = vector.load %arg3[%c0_2, %c0_3, %c0_4] : memref<1x32x128xbf16, #tpu.memory_space<vmem>>, vector<1x32x128xbf16>
    %3 = vector.shape_cast %2 : vector<1x32x128xbf16> to vector<32x128xbf16>
    %c0_5 = arith.constant 0 : index
    %c0_6 = arith.constant 0 : index
    %c0_7 = arith.constant 0 : index
    %4 = vector.load %arg4[%c0_5, %c0_6, %c0_7] : memref<1x9x128xbf16, #tpu.memory_space<vmem>>, vector<1x9x128xbf16>
    %5 = vector.shape_cast %4 : vector<1x9x128xbf16> to vector<9x128xbf16>
    %c0_8 = arith.constant 0 : index
    %c0_9 = arith.constant 0 : index
    %6 = vector.load %arg5[%c0_8, %c0_9] : memref<4x32xbf16, #tpu.memory_space<vmem>>, vector<4x32xbf16>
    %cst = arith.constant dense<0.000000e+00> : vector<32x64xf32>
    %7 = tpu.matmul %6, %1, %cst {dimension_numbers = #tpu.dot_dimension_numbers<[0], [0], [1], [1], [0, 1, 1, 1], [], []>} : vector<4x32xbf16>, vector<4x64xbf16>, vector<32x64xf32> -> vector<32x64xf32>
    %c0_10 = arith.constant 0 : index
    %c0_11 = arith.constant 0 : index
    %8 = vector.load %arg6[%c0_10, %c0_11] : memref<32x1xf32, #tpu.memory_space<vmem>>, vector<32x1xf32>
    %9 = vector.broadcast %8 : vector<32x1xf32> to vector<32x64xf32>
    %10 = arith.addf %7, %9 : vector<32x64xf32>
    %11 = arith.truncf %10 : vector<32x64xf32> to vector<32x64xbf16>
    %cst_12 = arith.constant dense<0.000000e+00> : vector<64x128xf32>
    %12 = tpu.matmul %11, %3, %cst_12 {dimension_numbers = #tpu.dot_dimension_numbers<[0], [0], [1], [1], [0, 1, 1, 1], [], []>} : vector<32x64xbf16>, vector<32x128xbf16>, vector<64x128xf32> -> vector<64x128xf32>
    %13 = tpu.iota {dimensions = array<i32: 1>} : vector<64x128xi32>
    %c64_i32 = arith.constant 64 : i32
    %14 = vector.broadcast %c64_i32 : i32 to vector<64x128xi32>
    %15 = arith.cmpi slt, %13, %14 : vector<64x128xi32>
    %cst_13 = arith.constant -1.000000e+30 : f32
    %16 = vector.broadcast %cst_13 : f32 to vector<64x128xf32>
    %17 = arith.select %15, %12, %16 : vector<64x128xi1>, vector<64x128xf32>
    %cst_14 = arith.constant dense<0xFF800000> : vector<64xf32>
    %18 = vector.multi_reduction <maximumf>, %17, %cst_14 [1] : vector<64x128xf32> to vector<64xf32>
    %19 = vector.shape_cast %18 : vector<64xf32> to vector<64x1xf32>
    %20 = vector.broadcast %19 : vector<64x1xf32> to vector<64x128xf32>
    %21 = arith.subf %17, %20 : vector<64x128xf32>
    %22 = math.exp %21 : vector<64x128xf32>
    %23 = arith.truncf %22 : vector<64x128xf32> to vector<64x128xbf16>
    %cst_15 = arith.constant dense<0.000000e+00> : vector<9x64xf32>
    %24 = tpu.matmul %5, %23, %cst_15 {dimension_numbers = #tpu.dot_dimension_numbers<[1], [1], [0], [0], [0, 0, 1, 0], [], []>} : vector<9x128xbf16>, vector<64x128xbf16>, vector<9x64xf32> -> vector<9x64xf32>
    %25 = vector.extract_strided_slice %24 {offsets = [8, 0], sizes = [1, 64], strides = [1, 1]} : vector<9x64xf32> to vector<1x64xf32>
    %26 = vector.extract_strided_slice %24 {offsets = [0, 0], sizes = [8, 64], strides = [1, 1]} : vector<9x64xf32> to vector<8x64xf32>
    %27 = tpu.reciprocal %25 {approx = true} : vector<1x64xf32> -> vector<1x64xf32>
    %28 = arith.mulf %25, %27 : vector<1x64xf32>
    %cst_16 = arith.constant 2.000000e+00 : f32
    %29 = vector.broadcast %cst_16 : f32 to vector<1x64xf32>
    %30 = arith.subf %29, %28 : vector<1x64xf32>
    %31 = arith.mulf %27, %30 : vector<1x64xf32>
    %32 = vector.broadcast %31 : vector<1x64xf32> to vector<8x64xf32>
    %33 = arith.mulf %26, %32 : vector<8x64xf32>
    %c0_17 = arith.constant 0 : index
    %c0_18 = arith.constant 0 : index
    %c0_19 = arith.constant 0 : index
    %34 = vector.load %arg7[%c0_17, %c0_18, %c0_19] : memref<1x8x64xf32, #tpu.memory_space<vmem>>, vector<1x8x64xf32>
    %35 = vector.shape_cast %34 : vector<1x8x64xf32> to vector<8x64xf32>
    %36 = vector.shape_cast %33 : vector<8x64xf32> to vector<1x8x64xf32>
    tpu.vector_store %arg7[%c0_17, %c0_18, %c0_19], %36 {strides = array<i32>} : memref<1x8x64xf32, #tpu.memory_space<vmem>>, vector<1x8x64xf32>,
    return
  }
  func.func @transform_0(%arg0: i32, %arg1: i32) -> (i32, i32, i32) {
    %c0_i32 = arith.constant 0 : i32
    %c0_i32_0 = arith.constant 0 : i32
    return %arg0, %c0_i32, %arg1 : i32, i32, i32
  }
  func.func @transform_1(%arg0: i32, %arg1: i32) -> (i32, i32, i32) {
    %c0_i32 = arith.constant 0 : i32
    %c0_i32_0 = arith.constant 0 : i32
    %c0_i32_1 = arith.constant 0 : i32
    return %arg0, %c0_i32, %c0_i32_0 : i32, i32, i32
  }
  func.func @transform_2(%arg0: i32, %arg1: i32) -> (i32, i32, i32) {
    %c0_i32 = arith.constant 0 : i32
    %c0_i32_0 = arith.constant 0 : i32
    %c0_i32_1 = arith.constant 0 : i32
    return %arg0, %c0_i32, %c0_i32_0 : i32, i32, i32
  }
  func.func @transform_3(%arg0: i32, %arg1: i32) -> (i32, i32) {
    %c0_i32 = arith.constant 0 : i32
    %c0_i32_0 = arith.constant 0 : i32
    %c0_i32_1 = arith.constant 0 : i32
    return %c0_i32, %c0_i32_0 : i32, i32
  }
  func.func @transform_4(%arg0: i32, %arg1: i32) -> (i32, i32) {
    %c0_i32 = arith.constant 0 : i32
    %c0_i32_0 = arith.constant 0 : i32
    %c0_i32_1 = arith.constant 0 : i32
    return %c0_i32, %c0_i32_0 : i32, i32
  }
  func.func @transform_5(%arg0: i32, %arg1: i32) -> (i32, i32, i32) {
    %c0_i32 = arith.constant 0 : i32
    %c0_i32_0 = arith.constant 0 : i32
    return %arg0, %c0_i32, %arg1 : i32, i32, i32
  }
}

module attributes {stable_mosaic.version = 11 : i64} {
  func.func @_cross_attention_kernel(%arg0: i32, %arg1: i32, %arg2: memref<1x4x64xbf16, #tpu.memory_space<vmem>>, %arg3: memref<1x32x128xbf16, #tpu.memory_space<vmem>>, %arg4: memref<1x9x128xbf16, #tpu.memory_space<vmem>>, %arg5: memref<4x32xbf16, #tpu.memory_space<vmem>>, %arg6: memref<32x1xf32, #tpu.memory_space<vmem>>, %arg7: memref<1x8x64xf32, #tpu.memory_space<vmem>>) attributes {dimension_semantics = [#tpu.dimension_semantics<parallel>, #tpu.dimension_semantics<parallel>], iteration_bounds = array<i64: 2, 1>, scalar_prefetch = 0 : i64, scratch_operands = 0 : i64, tpu.core_type = #tpu.core_type<tc>, window_params = [{transform_indices = @transform_0, window_bounds = array<i64: 1, 4, 64>}, {transform_indices = @transform_1, window_bounds = array<i64: 1, 32, 128>}, {transform_indices = @transform_2, window_bounds = array<i64: 1, 9, 128>}, {pipeline_mode = #tpu.pipeline_mode<synchronous>, transform_indices = @transform_3, window_bounds = array<i64: 4, 32>}, {pipeline_mode = #tpu.pipeline_mode<synchronous>, transform_indices = @transform_4, window_bounds = array<i64: 32, 1>}, {transform_indices = @transform_5, window_bounds = array<i64: 1, 8, 64>}]} {
    %c0 = arith.constant 0 : index
    %c0_0 = arith.constant 0 : index
    %c0_1 = arith.constant 0 : index
    %0 = vector.load %arg2[%c0, %c0_0, %c0_1] : memref<1x4x64xbf16, #tpu.memory_space<vmem>>, vector<1x4x64xbf16>
    %1 = vector.shape_cast %0 : vector<1x4x64xbf16> to vector<4x64xbf16>
    %c0_2 = arith.constant 0 : index
    %c0_3 = arith.constant 0 : index
    %c0_4 = arith.constant 0 : index
    %2 = vector.load %arg3[%c0_2, %c0_3, %c0_4] : memref<1x32x128xbf16, #tpu.memory_space<vmem>>, vector<1x32x128xbf16>
    %3 = vector.shape_cast %2 : vector<1x32x128xbf16> to vector<32x128xbf16>
    %c0_5 = arith.constant 0 : index
    %c0_6 = arith.constant 0 : index
    %c0_7 = arith.constant 0 : index
    %4 = vector.load %arg4[%c0_5, %c0_6, %c0_7] : memref<1x9x128xbf16, #tpu.memory_space<vmem>>, vector<1x9x128xbf16>
    %5 = vector.shape_cast %4 : vector<1x9x128xbf16> to vector<9x128xbf16>
    %c0_8 = arith.constant 0 : index
    %c0_9 = arith.constant 0 : index
    %6 = vector.load %arg5[%c0_8, %c0_9] : memref<4x32xbf16, #tpu.memory_space<vmem>>, vector<4x32xbf16>
    %cst = arith.constant dense<0.000000e+00> : vector<32x64xf32>
    %7 = tpu.matmul %6, %1, %cst {dimension_numbers = #tpu.dot_dimension_numbers<[0], [0], [1], [1], [0, 1, 1, 1], [], []>} : vector<4x32xbf16>, vector<4x64xbf16>, vector<32x64xf32> -> vector<32x64xf32>
    %c0_10 = arith.constant 0 : index
    %c0_11 = arith.constant 0 : index
    %8 = vector.load %arg6[%c0_10, %c0_11] : memref<32x1xf32, #tpu.memory_space<vmem>>, vector<32x1xf32>
    %9 = vector.broadcast %8 : vector<32x1xf32> to vector<32x64xf32>
    %10 = arith.addf %7, %9 : vector<32x64xf32>
    %11 = arith.truncf %10 : vector<32x64xf32> to vector<32x64xbf16>
    %cst_12 = arith.constant dense<0.000000e+00> : vector<64x128xf32>
    %12 = tpu.matmul %11, %3, %cst_12 {dimension_numbers = #tpu.dot_dimension_numbers<[0], [0], [1], [1], [0, 1, 1, 1], [], []>} : vector<32x64xbf16>, vector<32x128xbf16>, vector<64x128xf32> -> vector<64x128xf32>
    %13 = tpu.iota {dimensions = array<i32: 1>} : vector<64x128xi32>
    %c64_i32 = arith.constant 64 : i32
    %14 = vector.broadcast %c64_i32 : i32 to vector<64x128xi32>
    %15 = arith.cmpi slt, %13, %14 : vector<64x128xi32>
    %cst_13 = arith.constant -1.000000e+30 : f32
    %16 = vector.broadcast %cst_13 : f32 to vector<64x128xf32>
    %17 = arith.select %15, %12, %16 : vector<64x128xi1>, vector<64x128xf32>
    %cst_14 = arith.constant dense<0xFF800000> : vector<64xf32>
    %18 = vector.multi_reduction <maximumf>, %17, %cst_14 [1] : vector<64x128xf32> to vector<64xf32>
    %19 = vector.shape_cast %18 : vector<64xf32> to vector<64x1xf32>
    %20 = vector.broadcast %19 : vector<64x1xf32> to vector<64x128xf32>
    %21 = arith.subf %17, %20 : vector<64x128xf32>
    %22 = math.exp %21 : vector<64x128xf32>
    %23 = arith.truncf %22 : vector<64x128xf32> to vector<64x128xbf16>
    %cst_15 = arith.constant dense<0.000000e+00> : vector<9x64xf32>
    %24 = tpu.matmul %5, %23, %cst_15 {dimension_numbers = #tpu.dot_dimension_numbers<[1], [1], [0], [0], [0, 0, 1, 0], [], []>} : vector<9x128xbf16>, vector<64x128xbf16>, vector<9x64xf32> -> vector<9x64xf32>
    %25 = vector.extract_strided_slice %24 {offsets = [8, 0], sizes = [1, 64], strides = [1, 1]} : vector<9x64xf32> to vector<1x64xf32>
    %26 = vector.extract_strided_slice %24 {offsets = [0, 0], sizes = [8, 64], strides = [1, 1]} : vector<9x64xf32> to vector<8x64xf32>
    %27 = tpu.reciprocal %25 {approx = true} : vector<1x64xf32> -> vector<1x64xf32>
    %28 = arith.mulf %25, %27 : vector<1x64xf32>
    %cst_16 = arith.constant 2.000000e+00 : f32
    %29 = vector.broadcast %cst_16 : f32 to vector<1x64xf32>
    %30 = arith.subf %29, %28 : vector<1x64xf32>
    %31 = arith.mulf %27, %30 : vector<1x64xf32>
    %32 = vector.broadcast %31 : vector<1x64xf32> to vector<8x64xf32>
    %33 = arith.mulf %26, %32 : vector<8x64xf32>
    %c0_17 = arith.constant 0 : index
    %c0_18 = arith.constant 0 : index
    %c0_19 = arith.constant 0 : index
    %34 = vector.load %arg7[%c0_17, %c0_18, %c0_19] : memref<1x8x64xf32, #tpu.memory_space<vmem>>, vector<1x8x64xf32>
    %35 = vector.shape_cast %34 : vector<1x8x64xf32> to vector<8x64xf32>
    %36 = vector.shape_cast %33 : vector<8x64xf32> to vector<1x8x64xf32>
    tpu.vector_store %arg7[%c0_17, %c0_18, %c0_19], %36 {strides = array<i32>} : memref<1x8x64xf32, #tpu.memory_space<vmem>>, vector<1x8x64xf32>,
    return
  }
  func.func @transform_0(%arg0: i32, %arg1: i32) -> (i32, i32, i32) {
    %c0_i32 = arith.constant 0 : i32
    %c0_i32_0 = arith.constant 0 : i32
    return %arg0, %c0_i32, %arg1 : i32, i32, i32
  }
  func.func @transform_1(%arg0: i32, %arg1: i32) -> (i32, i32, i32) {
    %c0_i32 = arith.constant 0 : i32
    %c0_i32_0 = arith.constant 0 : i32
    %c0_i32_1 = arith.constant 0 : i32
    return %arg0, %c0_i32, %c0_i32_0 : i32, i32, i32
  }
  func.func @transform_2(%arg0: i32, %arg1: i32) -> (i32, i32, i32) {
    %c0_i32 = arith.constant 0 : i32
    %c0_i32_0 = arith.constant 0 : i32
    %c0_i32_1 = arith.constant 0 : i32
    return %arg0, %c0_i32, %c0_i32_0 : i32, i32, i32
  }
  func.func @transform_3(%arg0: i32, %arg1: i32) -> (i32, i32) {
    %c0_i32 = arith.constant 0 : i32
    %c0_i32_0 = arith.constant 0 : i32
    %c0_i32_1 = arith.constant 0 : i32
    return %c0_i32, %c0_i32_0 : i32, i32
  }
  func.func @transform_4(%arg0: i32, %arg1: i32) -> (i32, i32) {
    %c0_i32 = arith.constant 0 : i32
    %c0_i32_0 = arith.constant 0 : i32
    %c0_i32_1 = arith.constant 0 : i32
    return %c0_i32, %c0_i32_0 : i32, i32
  }
  func.func @transform_5(%arg0: i32, %arg1: i32) -> (i32, i32, i32) {
    %c0_i32 = arith.constant 0 : i32
    %c0_i32_0 = arith.constant 0 : i32
    return %arg0, %c0_i32, %arg1 : i32, i32, i32
  }
}

</mosaic_0001>

<bundles_post_ra>
// kernel: _cross_attention_impl.1
= control target key start
LH: loop header
LB: loop body
LE: loop exit
PB: predicated region body
PF: predicated region fallthrough
CT: control target
= control target key end

     0   :  { %s902_s18 = smov 0   ;;  %s904_s19 = smov 0   ;;  %s978_s0 = inlined_call_operand.vmem [shape: bf16[2,4,64], index: 0, kind: input, shape index: {}]   ;;  %s979_s1 = inlined_call_operand.vmem [shape: bf16[2,32,128], index: 1, kind: input, shape index: {}]   ;;  %s980_s2 = inlined_call_operand.vmem [shape: bf16[2,9,128], index: 2, kind: input, shape index: {}]   ;;  %s981_s3 = inlined_call_operand.vmem [shape: bf16[4,32], index: 3, kind: input, shape index: {}]   ;;  %s982_s4 = inlined_call_operand.vmem [shape: f32[32,1], index: 4, kind: input, shape index: {}]   ;;  %s983_s5 = inlined_call_operand.vmem [shape: f32[2,8,64], index: 5, kind: output, shape index: {}]  }
   0x1   :  { %s906_s20 = smov 0  }
   0x2 LB: > { %s27_s21 = sadd.s32 1, %s863_s19  ;;  %p730_p0 = scmp.ge.s32.totalorder %s867_s20, 1  ;;  %s867_s20 = sphi %s906_s20, %s15_s20   ;;  %s863_s19 = sphi %s904_s19, %s985_s19   ;;  %s859_s18 = sphi %s902_s18, %s984_s18  }
   0x3   : > { %p29_p1 = scmp.ge.s32.totalorder %s27_s21, 2  ;;  %p225_p2 = scmp.lt.s32.totalorder %s867_s20, 3 }
   0x5   : > { %s987_s21 = smov (%p29_p1, %s27_s21), 0  ;;  %p226_p3 = pnand %p730_p0, %p225_p2 }
   0x6   : > { %v299_v0 = vld [vmem:[%s981_s3] sm:$0x3] (!%p226_p3)  ;;  %p267_p4 = scmp.lt.s32.totalorder (!%p226_p3), %s859_s18, 1  ;;  %v869_v1 = vmov (!%p226_p3), 0   ;;  %v301_v2 = vld [vmem:[%s982_s4 + $0x8] sm:$0xff] (!%p226_p3)  ;;  %v302_v3 = vld [vmem:[%s982_s4 + $0x10] sm:$0xff] (!%p226_p3)  ;;  %v508_v30 = vlaneseq (!%p226_p3) }
   0x7   : > { %229 = sbr.rel (%p226_p3) target bundleno = 1084 (0x43c), region = 40  ;;  %324 = vxpose.xlu0.c.b16.start.end [1/1] (short) (narrow) (!%p226_p3), %v299_v0, 32  ;;  %823 = vset.pattern.permute.xlu1 (!%p226_p3), %v869_v1  ;;  %vm347_vm0 = vcmask (!%p226_p3), 1041408   ;;  %v303_v6 = vld [vmem:[%s982_s4 + $0x18] sm:$0xff] (!%p226_p3)  ;;  %v300_v7 = vld [vmem:[%s982_s4] sm:$0xff] (!%p226_p3)  ;;  %vm340_vm1 = vcmask (!%p226_p3), 31744  }
   0x8   : > { %311 = vperm.xlu1 (!%p226_p3), %823, %v301_v2   ;;  %vm430_vm2 = vcmask (!%p226_p3), 261120   ;;  %v509_v31 = vand.u32 (!%p226_p3), 127, %v508_v30  ;;  %v870_v48 = vmov (!%p226_p3), 0.0   ;;  %vm871_vm4 = vmmov (!%p226_p3), 0  }
   0x9   : > { %782 = vmatprep.subr.bf16.mxu0 (!%p226_p3), %v870_v48  ;;  %790 = vmatprep.mubr.msk.bf16.mxu0 (!%p226_p3), %vm871_vm4, %v870_v48  ;;  %vm619_vm5 = vcmask (!%p226_p3), 523264  }
   0xa   : > { %vm510_vm3 = vcmp.lt.s32.totalorder (!%p226_p3), %v509_v31, 64 }
   0xc   : > { %316 = vperm.xlu1 (!%p226_p3), %823, %v302_v3  }
   0xe   : > { %s989_s18 = smov (!%p267_p4, %s859_s18), 1 }
   0xf   : > { %s731_s28 = sshll.u32 %s989_s18, 1  ;;  %s748_s11 = sshll.u32 %s989_s18, 4 }
  0x10   : > { %s273_s6 = scalar_lea.vmem %s978_s0, %s731_s28  ;;  %321 = vperm.xlu1 %823, %v303_v6   ;;  %822 = vset.pattern.permute.xlu0 %v869_v1  ;;  %s278_s14 = scalar_lea.vmem %s979_s1, %s748_s11 }
  0x11   : > { %v292_v4 = vld [vmem:[%s273_s6] sm:$0x3]  ;;  %v825_v11 = vld [vmem:[%s278_s14 + $0x8] sm:$0xff]   ;;  %s749_s15 = sshll.u32 %s989_s18, 3 }
  0x12   : > { %794 = vmatprep.subr.msk.bf16.mxu1 %vm347_vm0, %v292_v4  ;;  %v349_v5 = vsel %vm347_vm0, %v292_v4, 0  ;;  %v824_v10 = vld [vmem:[%s278_s14] sm:$0xff]   ;;  %s960_s22 = scalar_lea.vmem %s980_s2, %s749_s15  ;;  %s290_s25 = scalar_lea.vmem %s983_s5, %s749_s15 }
  0x13   : > { %765 = vmatpush3.bf16.msra.mxu1 %v349_v5 }
  0x14   : > { %306 = vperm.xlu0 %822, %v300_v7   ;;  %770 = vmatprep.subr.bf16.mxu1 %v824_v10 }
  0x6d   : > { %v332_v8 = vpop.trf.xlu0 }
  0x6e   : > { %766 = vmatprep.mubr.msk.bf16.mxu1 %vm340_vm1, %v332_v8 }
  0x71   : > { %v333_v9 = vpop.trf.xlu0 }
  0x72   : > { %767 = vmatmul.mubr.msk.bf16.vlgmr.msra.gmra.mrb[0].mxu1 %vm340_vm1, %v333_v9 }
  0x73   : > { %771 = vmatpush3.bf16.msra.mxu1 %v824_v10 }
  0x74   : > { %772 = vmatprep.subr.bf16.mxu1 %v825_v11 }
  0x77   : > { %773 = vmatpush3.bf16.msra.mxu1 %v825_v11 }
  0x87   : > { %v312_v12 = vpop.permute.xlu1 %311 }
  0x8b   : > { %v317_v13 = vpop.permute.xlu1 %316 }
  0x8f   : > { %v322_v17 = vpop.permute.xlu1 %321 }
  0x93   : > { %v307_v15 = vpop.permute.xlu0 %306 }
 0x145   : > { %v768_v14 = vpop.f32.mrb[0].mxu1 }
 0x146   : > { %v385_v16 = vpop.f32.mrb[1].mxu1  ;;  %v394_v19 = vadd.f32 %v768_v14, %v317_v13 }
 0x147   : > { %v769_v18 = vpop.f32.mrb[2].mxu1  ;;  %v386_v22 = vadd.f32 %v385_v16, %v307_v15 }
 0x148   : > { %v397_v20 = vadd.f32 %v769_v18, %v322_v17  ;;  %v388_v21 = vpop.f32.mrb[3].mxu1 }
 0x149   : > { %v389_v23 = vadd.f32 %v388_v21, %v312_v12  ;;  %v826_v21 = vld [vmem:[%s960_s22] sm:$0x1f]  }
 0x14a   : > { %v401_v24 = vpack.c.bf16 %v397_v20, %v394_v19 }
 0x14b   : > { %v400_v25 = vpack.c.bf16 %v389_v23, %v386_v22 }
 0x14d   : > { %402 = vxpose.xlu1.c.b16.start [1/2] (short) (narrow) %v400_v25, 64 }
 0x151   : > { %403 = vxpose.xlu1.c.b16.end [2/2] (short) (narrow) %v401_v24, 64 }
 0x1b3   : > { %v410_v26 = vpop.trf.xlu1 }
 0x1b4   : > { %774 = vmatprep.mubr.msk.bf16.mxu1 %vm430_vm2, %v410_v26  ;;  %v615_v26 = vshrl.u32 %v508_v30, 7 }
 0x1b6   : > { %v616_v31 = vsub.s32 0, %v615_v26 }
 0x1b7   : > { %v411_v27 = vpop.trf.xlu1 }
 0x1b8   : > { %775 = vmatmul.mubr.msk.bf16.vlgmr.msra.gmra.mrb[4].mxu1 %vm430_vm2, %v411_v27 }
 0x1bb   : > { %v412_v28 = vpop.trf.xlu1 }
 0x1bc   : > { %778 = vmatprep.mubr.msk.bf16.mxu1 %vm430_vm2, %v412_v28 }
 0x1bf   : > { %v413_v29 = vpop.trf.xlu1 }
 0x1c0   : > { %779 = vmatmul.mubr.msk.bf16.gmra.mrb[8].mxu1 %vm430_vm2, %v413_v29 }
 0x28b   : > { %v776_v32 = vpop.f32.mrb[4].mxu1 }
 0x28c   : > { %v477_v33 = vpop.f32.mrb[5].mxu1  ;;  %v513_v34 = vsel %vm510_vm3, %v776_v32, -1e+30 }
 0x28d   : > { %523 = vmax.xlane.f32.xlu1 %v513_v34  ;;  %v777_v35 = vpop.f32.mrb[6].mxu1  ;;  %v511_v36 = vsel %vm510_vm3, %v477_v33, -1e+30 }
 0x28e   : > { %519 = vmax.xlane.f32.xlu0 %v511_v36  ;;  %v480_v37 = vpop.f32.mrb[7].mxu1  ;;  %v514_v41 = vsel %vm510_vm3, %v777_v35, -1e+30 }
 0x28f   : > { %v512_v38 = vsel %vm510_vm3, %v480_v37, -1e+30 }
 0x292   : > { %521 = vmax.xlane.f32.xlu0 %v512_v38 }
 0x293   : > { %v780_v39 = vpop.f32.mrb[8].mxu1 }
 0x294   : > { %v493_v40 = vpop.f32.mrb[9].mxu1  ;;  %v517_v46 = vsel %vm510_vm3, %v780_v39, -1e+30 }
 0x295   : > { %v781_v42 = vpop.f32.mrb[10].mxu1  ;;  %v515_v44 = vsel %vm510_vm3, %v493_v40, -1e+30 }
 0x296   : > { %525 = vmax.xlane.f32.xlu0 %v514_v41  ;;  %v496_v43 = vpop.f32.mrb[11].mxu1  ;;  %v518_v47 = vsel %vm510_vm3, %v781_v42, -1e+30 }
 0x297   : > { %v516_v45 = vsel %vm510_vm3, %v496_v43, -1e+30 }
 0x29a   : > { %527 = vmax.xlane.f32.xlu0 %v515_v44 }
 0x29e   : > { %529 = vmax.xlane.f32.xlu0 %v516_v45 }
 0x2a2   : > { %531 = vmax.xlane.f32.xlu0 %v517_v46 }
 0x2a6   : > { %533 = vmax.xlane.f32.xlu0 %v518_v47 }
 0x31a   : > { %v524_v54 = vpop.xlane.xlu1 %523 }
 0x31b   : > { %v520_v49 = vpop.xlane.xlu0 %519  ;;  %v537_v57 = vsub.f32 %v513_v34, %v524_v54 }
 0x31c   : > { %v535_v50 = vsub.f32 %v511_v36, %v520_v49 }
 0x31d   : > { %v547_v61 = vmul.f32 1.442695, %v537_v57 }
 0x31e   : > { %v543_v51 = vmul.f32 1.442695, %v535_v50 }
 0x31f   : > { %v522_v52 = vpop.xlane.xlu0 %521 }
 0x320   : > { %v536_v53 = vsub.f32 %v512_v38, %v522_v52  ;;  %827 = vpow2.f32 %v543_v51 }
 0x322   : > { %v545_v55 = vmul.f32 1.442695, %v536_v53 }
 0x323   : > { %v526_v56 = vpop.xlane.xlu0 %525 }
 0x324   : > { %829 = vpow2.f32 %v545_v55  ;;  %v538_v58 = vsub.f32 %v514_v41, %v526_v56 }
 0x326   : > { %v549_v59 = vmul.f32 1.442695, %v538_v58 }
 0x327   : > { %v528_v60 = vpop.xlane.xlu0 %527 }
 0x328   : > { %831 = vpow2.f32 %v549_v59  ;;  %v539_v63 = vsub.f32 %v515_v44, %v528_v60 }
 0x329   : > { %833 = vpow2.f32 %v547_v61 }
 0x32a   : > { %v828_v1 = vpop.eup %827  ;;  %v551_v6 = vmul.f32 1.442695, %v539_v63 }
 0x32b   : > { %v530_v62 = vpop.xlane.xlu0 %529 }
 0x32c   : > { %v540_v0 = vsub.f32 %v516_v45, %v530_v62 }
 0x32e   : > { %v830_v2 = vpop.eup %829  ;;  %v553_v3 = vmul.f32 1.442695, %v540_v0 }
 0x32f   : > { %v532_v4 = vpop.xlane.xlu0 %531  ;;  %v559_v5 = vpack.c.bf16 %v830_v2, %v828_v1 }
 0x330   : > { %835 = vpow2.f32 %v553_v3  ;;  %v541_v9 = vsub.f32 %v517_v46, %v532_v4 }
 0x331   : > { %783 = vmatpush3.bf16.xpose.msra.mxu0 %v559_v5  ;;  %837 = vpow2.f32 %v551_v6 }
 0x332   : > { %784 = vmatprep.subr.bf16.mxu0 %v870_v48  ;;  %v832_v8 = vpop.eup %831  ;;  %v555_v14 = vmul.f32 1.442695, %v541_v9 }
 0x333   : > { %v534_v7 = vpop.xlane.xlu0 %533  ;;  %v834_v11 = vpop.eup %833 }
 0x334   : > { %v542_v10 = vsub.f32 %v518_v47, %v534_v7  ;;  %v560_v13 = vpack.c.bf16 %v832_v8, %v834_v11 }
 0x336   : > { %v557_v12 = vmul.f32 1.442695, %v542_v10 }
 0x338   : > { %839 = vpow2.f32 %v557_v12 }
 0x339   : > { %785 = vmatpush3.bf16.xpose.msra.mxu0 %v560_v13  ;;  %841 = vpow2.f32 %v555_v14 }
 0x33a   : > { %786 = vmatprep.subr.bf16.mxu0 %v870_v48  ;;  %v836_v15 = vpop.eup %835 }
 0x33b   : > { %v838_v16 = vpop.eup %837 }
 0x33c   : > { %v561_v17 = vpack.c.bf16 %v836_v15, %v838_v16 }
 0x341   : > { %787 = vmatpush3.bf16.xpose.msra.mxu0 %v561_v17 }
 0x342   : > { %788 = vmatprep.subr.bf16.mxu0 %v870_v48  ;;  %v840_v18 = vpop.eup %839 }
 0x343   : > { %v842_v19 = vpop.eup %841 }
 0x344   : > { %v562_v20 = vpack.c.bf16 %v840_v18, %v842_v19 }
 0x349   : > { %789 = vmatpush3.bf16.xpose.msra.mxu0 %v562_v20 }
 0x350   : > { %791 = vmatmul.mubr.bf16.vlgmr.msra.gmra.mrb[0].mxu0 %v826_v21 }
 0x423   : > { %v603_v22 = vpop.f32.mrb[0].mxu0 }
 0x424   : > { %v792_v23 = vpop.f32.mrb[1].mxu0 }
 0x425   : > { %v606_v24 = vpop.f32.mrb[2].mxu0 }
 0x426   : > { %843 = vrcp.f32 %v606_v24  ;;  %v793_v25 = vpop.f32.mrb[3].mxu0 }
 0x430   : > { %v844_v27 = vpop.eup %843 }
 0x431   : > { %v611_v28 = vmul.f32 %v844_v27, %v606_v24 }
 0x433   : > { %v612_v29 = vsub.f32 2.0, %v611_v28 }
 0x435   : > { %v613_v32 = vmul.f32 %v844_v27, %v612_v29 }
 0x437   : > { %v617_v33 = vrot.slane %v613_v32, %v616_v31 }
 0x439   : > { %v618_v34 = vmul.f32 %v617_v33, %v603_v22 }
 0x43b   : > { %620 = vst.msk [vmem:[%s290_s25] sm:$0xff] %vm619_vm5, %v618_v34 }
 0x43c PF: > { %s15_s20 = sadd.s32 1, %s867_s20   ;;  %s984_s18 = smov %s863_s19 }
 0x43d   : > { %p12_p5 = scmp.ge.s32.totalorder %s15_s20, 4   ;;  %s985_s19 = smov %s987_s21 }
 0x43f   :  { %14 = sbr.rel (!%p12_p5) target bundleno = 2 (0x2), region = 76 }

// kernel: _cross_attention_impl.1
= control target key start
LH: loop header
LB: loop body
LE: loop exit
PB: predicated region body
PF: predicated region fallthrough
CT: control target
= control target key end

     0   :  { %s895_s18 = smov 0   ;;  %s897_s19 = smov 0   ;;  %s971_s0 = inlined_call_operand.vmem [shape: bf16[2,4,64], index: 0, kind: input, shape index: {}]   ;;  %s972_s1 = inlined_call_operand.vmem [shape: bf16[2,32,128], index: 1, kind: input, shape index: {}]   ;;  %s973_s2 = inlined_call_operand.vmem [shape: bf16[2,9,128], index: 2, kind: input, shape index: {}]   ;;  %s974_s3 = inlined_call_operand.vmem [shape: bf16[4,32], index: 3, kind: input, shape index: {}]   ;;  %s975_s4 = inlined_call_operand.vmem [shape: f32[32,1], index: 4, kind: input, shape index: {}]   ;;  %s976_s5 = inlined_call_operand.vmem [shape: f32[2,8,64], index: 5, kind: output, shape index: {}]  }
   0x1   :  { %s899_s20 = smov 0  }
   0x2 LB: > { %s27_s21 = sadd.s32 1, %s856_s19  ;;  %p723_p0 = scmp.ge.s32.totalorder %s860_s20, 1  ;;  %s860_s20 = sphi %s899_s20, %s15_s20   ;;  %s856_s19 = sphi %s897_s19, %s978_s19   ;;  %s852_s18 = sphi %s895_s18, %s977_s18  }
   0x3   : > { %p29_p1 = scmp.ge.s32.totalorder %s27_s21, 2  ;;  %p225_p2 = scmp.lt.s32.totalorder %s860_s20, 3 }
   0x5   : > { %s980_s21 = smov (%p29_p1, %s27_s21), 0  ;;  %p226_p3 = pnand %p723_p0, %p225_p2 }
   0x6   : > { %v299_v0 = vld [vmem:[%s974_s3] sm:$0x3] (!%p226_p3)  ;;  %p267_p4 = scmp.lt.s32.totalorder (!%p226_p3), %s852_s18, 1  ;;  %v862_v1 = vmov (!%p226_p3), 0   ;;  %v301_v2 = vld [vmem:[%s975_s4 + $0x8] sm:$0xff] (!%p226_p3)  ;;  %v302_v3 = vld [vmem:[%s975_s4 + $0x10] sm:$0xff] (!%p226_p3)  ;;  %v508_v30 = vlaneseq (!%p226_p3) }
   0x7   : > { %229 = sbr.rel (%p226_p3) target bundleno = 1084 (0x43c), region = 40  ;;  %324 = vxpose.xlu0.c.b16.start.end [1/1] (short) (narrow) (!%p226_p3), %v299_v0, 32  ;;  %816 = vset.pattern.permute.xlu1 (!%p226_p3), %v862_v1  ;;  %vm347_vm0 = vcmask (!%p226_p3), 1041408   ;;  %v303_v6 = vld [vmem:[%s975_s4 + $0x18] sm:$0xff] (!%p226_p3)  ;;  %v300_v7 = vld [vmem:[%s975_s4] sm:$0xff] (!%p226_p3)  ;;  %vm340_vm1 = vcmask (!%p226_p3), 31744  }
   0x8   : > { %311 = vperm.xlu1 (!%p226_p3), %816, %v301_v2   ;;  %vm430_vm2 = vcmask (!%p226_p3), 261120   ;;  %v509_v31 = vand.u32 (!%p226_p3), 127, %v508_v30  ;;  %v863_v48 = vmov (!%p226_p3), 0.0   ;;  %vm864_vm4 = vmmov (!%p226_p3), 0  }
   0x9   : > { %775 = vmatprep.subr.bf16.mxu0 (!%p226_p3), %v863_v48  ;;  %783 = vmatprep.mubr.msk.bf16.mxu0 (!%p226_p3), %vm864_vm4, %v863_v48  ;;  %vm619_vm5 = vcmask (!%p226_p3), 523264  }
   0xa   : > { %vm510_vm3 = vcmp.lt.s32.totalorder (!%p226_p3), %v509_v31, 64 }
   0xc   : > { %316 = vperm.xlu1 (!%p226_p3), %816, %v302_v3  }
   0xe   : > { %s982_s18 = smov (!%p267_p4, %s852_s18), 1 }
   0xf   : > { %s724_s28 = sshll.u32 %s982_s18, 1  ;;  %s741_s11 = sshll.u32 %s982_s18, 4 }
  0x10   : > { %s273_s6 = scalar_lea.vmem %s971_s0, %s724_s28  ;;  %321 = vperm.xlu1 %816, %v303_v6   ;;  %815 = vset.pattern.permute.xlu0 %v862_v1  ;;  %s278_s14 = scalar_lea.vmem %s972_s1, %s741_s11 }
  0x11   : > { %v292_v4 = vld [vmem:[%s273_s6] sm:$0x3]  ;;  %v818_v11 = vld [vmem:[%s278_s14 + $0x8] sm:$0xff]   ;;  %s742_s15 = sshll.u32 %s982_s18, 3 }
  0x12   : > { %787 = vmatprep.subr.msk.bf16.mxu1 %vm347_vm0, %v292_v4  ;;  %v349_v5 = vsel %vm347_vm0, %v292_v4, 0  ;;  %v817_v10 = vld [vmem:[%s278_s14] sm:$0xff]   ;;  %s953_s22 = scalar_lea.vmem %s973_s2, %s742_s15  ;;  %s290_s25 = scalar_lea.vmem %s976_s5, %s742_s15 }
  0x13   : > { %758 = vmatpush3.bf16.msra.mxu1 %v349_v5 }
  0x14   : > { %306 = vperm.xlu0 %815, %v300_v7   ;;  %763 = vmatprep.subr.bf16.mxu1 %v817_v10 }
  0x6d   : > { %v332_v8 = vpop.trf.xlu0 }
  0x6e   : > { %759 = vmatprep.mubr.msk.bf16.mxu1 %vm340_vm1, %v332_v8 }
  0x71   : > { %v333_v9 = vpop.trf.xlu0 }
  0x72   : > { %760 = vmatmul.mubr.msk.bf16.vlgmr.msra.gmra.mrb[0].mxu1 %vm340_vm1, %v333_v9 }
  0x73   : > { %764 = vmatpush3.bf16.msra.mxu1 %v817_v10 }
  0x74   : > { %765 = vmatprep.subr.bf16.mxu1 %v818_v11 }
  0x77   : > { %766 = vmatpush3.bf16.msra.mxu1 %v818_v11 }
  0x87   : > { %v312_v12 = vpop.permute.xlu1 %311 }
  0x8b   : > { %v317_v13 = vpop.permute.xlu1 %316 }
  0x8f   : > { %v322_v17 = vpop.permute.xlu1 %321 }
  0x93   : > { %v307_v15 = vpop.permute.xlu0 %306 }
 0x145   : > { %v761_v14 = vpop.f32.mrb[0].mxu1 }
 0x146   : > { %v385_v16 = vpop.f32.mrb[1].mxu1  ;;  %v394_v19 = vadd.f32 %v761_v14, %v317_v13 }
 0x147   : > { %v762_v18 = vpop.f32.mrb[2].mxu1  ;;  %v386_v22 = vadd.f32 %v385_v16, %v307_v15 }
 0x148   : > { %v397_v20 = vadd.f32 %v762_v18, %v322_v17  ;;  %v388_v21 = vpop.f32.mrb[3].mxu1 }
 0x149   : > { %v389_v23 = vadd.f32 %v388_v21, %v312_v12  ;;  %v819_v21 = vld [vmem:[%s953_s22] sm:$0x1f]  }
 0x14a   : > { %v401_v24 = vpack.c.bf16 %v397_v20, %v394_v19 }
 0x14b   : > { %v400_v25 = vpack.c.bf16 %v389_v23, %v386_v22 }
 0x14d   : > { %402 = vxpose.xlu1.c.b16.start [1/2] (short) (narrow) %v400_v25, 64 }
 0x151   : > { %403 = vxpose.xlu1.c.b16.end [2/2] (short) (narrow) %v401_v24, 64 }
 0x1b3   : > { %v410_v26 = vpop.trf.xlu1 }
 0x1b4   : > { %767 = vmatprep.mubr.msk.bf16.mxu1 %vm430_vm2, %v410_v26  ;;  %v615_v26 = vshrl.u32 %v508_v30, 7 }
 0x1b6   : > { %v616_v31 = vsub.s32 0, %v615_v26 }
 0x1b7   : > { %v411_v27 = vpop.trf.xlu1 }
 0x1b8   : > { %768 = vmatmul.mubr.msk.bf16.vlgmr.msra.gmra.mrb[4].mxu1 %vm430_vm2, %v411_v27 }
 0x1bb   : > { %v412_v28 = vpop.trf.xlu1 }
 0x1bc   : > { %771 = vmatprep.mubr.msk.bf16.mxu1 %vm430_vm2, %v412_v28 }
 0x1bf   : > { %v413_v29 = vpop.trf.xlu1 }
 0x1c0   : > { %772 = vmatmul.mubr.msk.bf16.gmra.mrb[8].mxu1 %vm430_vm2, %v413_v29 }
 0x28b   : > { %v769_v32 = vpop.f32.mrb[4].mxu1 }
 0x28c   : > { %v477_v33 = vpop.f32.mrb[5].mxu1  ;;  %v513_v34 = vsel %vm510_vm3, %v769_v32, -1e+30 }
 0x28d   : > { %523 = vmax.xlane.f32.xlu1 %v513_v34  ;;  %v770_v35 = vpop.f32.mrb[6].mxu1  ;;  %v511_v36 = vsel %vm510_vm3, %v477_v33, -1e+30 }
 0x28e   : > { %519 = vmax.xlane.f32.xlu0 %v511_v36  ;;  %v480_v37 = vpop.f32.mrb[7].mxu1  ;;  %v514_v41 = vsel %vm510_vm3, %v770_v35, -1e+30 }
 0x28f   : > { %v512_v38 = vsel %vm510_vm3, %v480_v37, -1e+30 }
 0x292   : > { %521 = vmax.xlane.f32.xlu0 %v512_v38 }
 0x293   : > { %v773_v39 = vpop.f32.mrb[8].mxu1 }
 0x294   : > { %v493_v40 = vpop.f32.mrb[9].mxu1  ;;  %v517_v46 = vsel %vm510_vm3, %v773_v39, -1e+30 }
 0x295   : > { %v774_v42 = vpop.f32.mrb[10].mxu1  ;;  %v515_v44 = vsel %vm510_vm3, %v493_v40, -1e+30 }
 0x296   : > { %525 = vmax.xlane.f32.xlu0 %v514_v41  ;;  %v496_v43 = vpop.f32.mrb[11].mxu1  ;;  %v518_v47 = vsel %vm510_vm3, %v774_v42, -1e+30 }
 0x297   : > { %v516_v45 = vsel %vm510_vm3, %v496_v43, -1e+30 }
 0x29a   : > { %527 = vmax.xlane.f32.xlu0 %v515_v44 }
 0x29e   : > { %529 = vmax.xlane.f32.xlu0 %v516_v45 }
 0x2a2   : > { %531 = vmax.xlane.f32.xlu0 %v517_v46 }
 0x2a6   : > { %533 = vmax.xlane.f32.xlu0 %v518_v47 }
 0x31a   : > { %v524_v54 = vpop.xlane.xlu1 %523 }
 0x31b   : > { %v520_v49 = vpop.xlane.xlu0 %519  ;;  %v537_v57 = vsub.f32 %v513_v34, %v524_v54 }
 0x31c   : > { %v535_v50 = vsub.f32 %v511_v36, %v520_v49 }
 0x31d   : > { %v547_v61 = vmul.f32 1.442695, %v537_v57 }
 0x31e   : > { %v543_v51 = vmul.f32 1.442695, %v535_v50 }
 0x31f   : > { %v522_v52 = vpop.xlane.xlu0 %521 }
 0x320   : > { %v536_v53 = vsub.f32 %v512_v38, %v522_v52  ;;  %820 = vpow2.f32 %v543_v51 }
 0x322   : > { %v545_v55 = vmul.f32 1.442695, %v536_v53 }
 0x323   : > { %v526_v56 = vpop.xlane.xlu0 %525 }
 0x324   : > { %822 = vpow2.f32 %v545_v55  ;;  %v538_v58 = vsub.f32 %v514_v41, %v526_v56 }
 0x326   : > { %v549_v59 = vmul.f32 1.442695, %v538_v58 }
 0x327   : > { %v528_v60 = vpop.xlane.xlu0 %527 }
 0x328   : > { %824 = vpow2.f32 %v549_v59  ;;  %v539_v63 = vsub.f32 %v515_v44, %v528_v60 }
 0x329   : > { %826 = vpow2.f32 %v547_v61 }
 0x32a   : > { %v821_v1 = vpop.eup %820  ;;  %v551_v6 = vmul.f32 1.442695, %v539_v63 }
 0x32b   : > { %v530_v62 = vpop.xlane.xlu0 %529 }
 0x32c   : > { %v540_v0 = vsub.f32 %v516_v45, %v530_v62 }
 0x32e   : > { %v823_v2 = vpop.eup %822  ;;  %v553_v3 = vmul.f32 1.442695, %v540_v0 }
 0x32f   : > { %v532_v4 = vpop.xlane.xlu0 %531  ;;  %v559_v5 = vpack.c.bf16 %v823_v2, %v821_v1 }
 0x330   : > { %828 = vpow2.f32 %v553_v3  ;;  %v541_v9 = vsub.f32 %v517_v46, %v532_v4 }
 0x331   : > { %776 = vmatpush3.bf16.xpose.msra.mxu0 %v559_v5  ;;  %830 = vpow2.f32 %v551_v6 }
 0x332   : > { %777 = vmatprep.subr.bf16.mxu0 %v863_v48  ;;  %v825_v8 = vpop.eup %824  ;;  %v555_v14 = vmul.f32 1.442695, %v541_v9 }
 0x333   : > { %v534_v7 = vpop.xlane.xlu0 %533  ;;  %v827_v11 = vpop.eup %826 }
 0x334   : > { %v542_v10 = vsub.f32 %v518_v47, %v534_v7  ;;  %v560_v13 = vpack.c.bf16 %v825_v8, %v827_v11 }
 0x336   : > { %v557_v12 = vmul.f32 1.442695, %v542_v10 }
 0x338   : > { %832 = vpow2.f32 %v557_v12 }
 0x339   : > { %778 = vmatpush3.bf16.xpose.msra.mxu0 %v560_v13  ;;  %834 = vpow2.f32 %v555_v14 }
 0x33a   : > { %779 = vmatprep.subr.bf16.mxu0 %v863_v48  ;;  %v829_v15 = vpop.eup %828 }
 0x33b   : > { %v831_v16 = vpop.eup %830 }
 0x33c   : > { %v561_v17 = vpack.c.bf16 %v829_v15, %v831_v16 }
 0x341   : > { %780 = vmatpush3.bf16.xpose.msra.mxu0 %v561_v17 }
 0x342   : > { %781 = vmatprep.subr.bf16.mxu0 %v863_v48  ;;  %v833_v18 = vpop.eup %832 }
 0x343   : > { %v835_v19 = vpop.eup %834 }
 0x344   : > { %v562_v20 = vpack.c.bf16 %v833_v18, %v835_v19 }
 0x349   : > { %782 = vmatpush3.bf16.xpose.msra.mxu0 %v562_v20 }
 0x350   : > { %784 = vmatmul.mubr.bf16.vlgmr.msra.gmra.mrb[0].mxu0 %v819_v21 }
 0x423   : > { %v603_v22 = vpop.f32.mrb[0].mxu0 }
 0x424   : > { %v785_v23 = vpop.f32.mrb[1].mxu0 }
 0x425   : > { %v606_v24 = vpop.f32.mrb[2].mxu0 }
 0x426   : > { %836 = vrcp.f32 %v606_v24  ;;  %v786_v25 = vpop.f32.mrb[3].mxu0 }
 0x430   : > { %v837_v27 = vpop.eup %836 }
 0x431   : > { %v611_v28 = vmul.f32 %v837_v27, %v606_v24 }
 0x433   : > { %v612_v29 = vsub.f32 2.0, %v611_v28 }
 0x435   : > { %v613_v32 = vmul.f32 %v837_v27, %v612_v29 }
 0x437   : > { %v617_v33 = vrot.slane %v613_v32, %v616_v31 }
 0x439   : > { %v618_v34 = vmul.f32 %v617_v33, %v603_v22 }
 0x43b   : > { %620 = vst.msk [vmem:[%s290_s25] sm:$0xff] %vm619_vm5, %v618_v34 }
 0x43c PF: > { %s15_s20 = sadd.s32 1, %s860_s20   ;;  %s977_s18 = smov %s856_s19 }
 0x43d   : > { %p12_p5 = scmp.ge.s32.totalorder %s15_s20, 4   ;;  %s978_s19 = smov %s980_s21 }
 0x43f   :  { %14 = sbr.rel (!%p12_p5) target bundleno = 2 (0x2), region = 76 }

</bundles_post_ra>
